<compile_context>
chip_gen: v6e
topology: v6e:2x2x1
jax: 0.10.0
libtpu: 0.0.40
codegen_flags: <defaults>
</compile_context>

<pallas_src>
import functools

import jax
import jax.numpy as jnp
from jax.experimental import pallas as pl
from jax.experimental.pallas import tpu as pltpu


def _disc_kernel(x_ref, w1_ref, b1_ref, w2_ref, b2_ref, w3_ref, b3_ref, o_ref):
    # x_ref: (tb, D) f32; w1: (D, Hp) bf16; w2: (Hp, Hp) bf16; biases f32;
    # w3: (1, Hp) f32; b3: (1, 1) f32; o_ref: (tb, 1) f32.
    x = x_ref[...].astype(jnp.bfloat16)                       # cast in-kernel (VPU, hidden under MXU)
    h1 = jnp.dot(x, w1_ref[...], preferred_element_type=jnp.float32)
    h1 = jnp.maximum(h1 + b1_ref[...], 0.0)
    h2 = jnp.dot(h1.astype(jnp.bfloat16), w2_ref[...],
                 preferred_element_type=jnp.float32)
    h2 = jnp.maximum(h2 + b2_ref[...], 0.0)
    # Layer 3: elementwise multiply (VPU) + lane reduction (XLU) -> (tb, 1).
    logits = jnp.sum(h2 * w3_ref[...], axis=-1, keepdims=True) + b3_ref[...]
    o_ref[...] = jax.nn.sigmoid(logits)


def _round_up(x, m):
    return ((x + m - 1) // m) * m


def _pad2(a, rows, cols):
    """Zero-pad a 2-D array up to (rows, cols)."""
    return jnp.zeros((rows, cols), a.dtype).at[: a.shape[0], : a.shape[1]].set(a)


def _choose_tile(n, tile_b):
    """Batch tile: multiple of 16 (bf16 sublanes), >=2 grid steps when possible
    so both v7x TensorCores get work, capped at tile_b."""
    half = -(-n // 2)  # cdiv(n, 2)
    tb = min(int(tile_b), _round_up(half, 16))
    return max(16, _round_up(tb, 16))


def _vmem_limit_bytes(tb, d, h_p):
    """Scoped-VMEM limit from actual need (double-buffered x/out/weights plus
    f32 intermediates and slack), clamped to [16 MiB, 64 MiB]."""
    x_tile = tb * d * 4
    out_tile = tb * 4
    weights = (d * h_p + h_p * h_p) * 2 + (3 * h_p + 1) * 4
    interm = 4 * tb * h_p * 4
    need = 2 * (x_tile + out_tile + weights) + interm + (4 << 20)
    return int(min(max(need, 16 << 20), 64 << 20))


def pack_params(params):
    """One-time weight packing (call once, outside the per-step forward).
    PyTorch layout in: w1 (H, D), b1 (H,), w2 (H, H), b2 (H,), w3 (1, H), b3 (1,).
    Returns lane-padded, MXU-ready tensors (bf16 weights, f32 biases/w3)."""
    w1, b1, w2, b2, w3, b3 = params
    h, d = w1.shape
    h_p = _round_up(h, 128)
    w1p = _pad2(w1.T.astype(jnp.float32), d, h_p).astype(jnp.bfloat16)    # (D, Hp)
    b1p = _pad2(b1.astype(jnp.float32)[None, :], 1, h_p)                  # (1, Hp)
    w2p = _pad2(w2.T.astype(jnp.float32), h_p, h_p).astype(jnp.bfloat16)  # (Hp, Hp)
    b2p = _pad2(b2.astype(jnp.float32)[None, :], 1, h_p)                  # (1, Hp)
    w3p = _pad2(w3.astype(jnp.float32), 1, h_p)                           # (1, Hp) f32
    b3p = b3.astype(jnp.float32).reshape(1, 1)                            # (1, 1)
    return (w1p, b1p, w2p, b2p, w3p, b3p)


@functools.partial(jax.jit, static_argnames=("tile_b",))
def discriminator_forward(x, packed, *, tile_b=1024):
    """x: (N, D) float32, packed = pack_params(params).  Returns (N, 1) f32."""
    w1p, b1p, w2p, b2p, w3p, b3p = packed
    x = x.astype(jnp.float32)
    n, d = x.shape
    h_p = w1p.shape[1]
    assert w1p.shape[0] == d, (w1p.shape, d)

    tb = _choose_tile(n, tile_b)
    grid = (pl.cdiv(n, tb),)
    const = lambda shape: pl.BlockSpec(shape, lambda i: (0, 0))

    out = pl.pallas_call(
        _disc_kernel,
        out_shape=jax.ShapeDtypeStruct((n, 1), jnp.float32),
        grid_spec=pltpu.PrefetchScalarGridSpec(
            num_scalar_prefetch=0,
            grid=grid,
            in_specs=[
                pl.BlockSpec((tb, d), lambda i: (i, 0)),  # x batch tile (f32, unpadded)
                const((d, h_p)),     # W1 (resident)
                const((1, h_p)),     # b1
                const((h_p, h_p)),   # W2 (resident)
                const((1, h_p)),     # b2
                const((1, h_p)),     # w3 row (f32)
                const((1, 1)),       # b3
            ],
            out_specs=pl.BlockSpec((tb, 1), lambda i: (i, 0)),
        ),
        compiler_params=pltpu.CompilerParams(
            dimension_semantics=("parallel",),
            vmem_limit_bytes=_vmem_limit_bytes(tb, d, h_p),
        ),
    )(x, w1p, b1p, w2p, b2p, w3p, b3p)
    return out


def init_params(key, input_dim, hidden_dim):
    """PyTorch nn.Linear-style init: weight (out, in), bias (out,), U(+-1/sqrt(fan_in))."""
    def linear(k, fan_in, fan_out):
        kw, kb = jax.random.split(k)
        bound = 1.0 / jnp.sqrt(fan_in)
        w = jax.random.uniform(kw, (fan_out, fan_in), jnp.float32, -bound, bound)
        b = jax.random.uniform(kb, (fan_out,), jnp.float32, -bound, bound)
        return w, b

    k1, k2, k3 = jax.random.split(key, 3)
    w1, b1 = linear(k1, input_dim, hidden_dim)
    w2, b2 = linear(k2, hidden_dim, hidden_dim)
    w3, b3 = linear(k3, hidden_dim, 1)
    return (w1, b1, w2, b2, w3, b3)


def reference_forward_matched(x, params):
    """Same math as the kernel: bf16 MXU operands for layers 1-2 (f32 acc),
    layer 3 fully in f32."""
    w1, b1, w2, b2, w3, b3 = params
    bf = jnp.bfloat16
    h1 = jnp.maximum(
        jnp.dot(x.astype(bf), w1.T.astype(bf), preferred_element_type=jnp.float32) + b1, 0.0)
    h2 = jnp.maximum(
        jnp.dot(h1.astype(bf), w2.T.astype(bf), preferred_element_type=jnp.float32) + b2, 0.0)
    z = h2 @ w3.T + b3
    return jax.nn.sigmoid(z)


def reference_forward_f32(x, params):
    w1, b1, w2, b2, w3, b3 = params
    h1 = jnp.maximum(x @ w1.T + b1, 0.0)
    h2 = jnp.maximum(h1 @ w2.T + b2, 0.0)
    return jax.nn.sigmoid(h2 @ w3.T + b3)


if __name__ == "__main__":
    # Small shapes consistent with the module (real input_dim=784; hidden
    # scaled down).  batch=48 with the auto-derived tile (32) exercises a
    # 2-step grid with a partial final tile; hidden=160 exercises 128-lane
    # padding of the weights (784 is handled unpadded as the full last dim).
    batch, input_dim, hidden_dim = 48, 784, 160

    key = jax.random.PRNGKey(0)
    k_x, k_p = jax.random.split(key)
    x = jax.random.normal(k_x, (batch, input_dim), jnp.float32)
    params = init_params(k_p, input_dim, hidden_dim)
    packed = pack_params(params)  # one-time packing, outside the forward path

    out = discriminator_forward(x, packed)
    out = jax.block_until_ready(out)
    assert out.shape == (batch, 1), out.shape

    ref_m = reference_forward_matched(x, params)
    assert jnp.allclose(out, ref_m, atol=5e-3, rtol=5e-3), (
        float(jnp.max(jnp.abs(out - ref_m)))
    )
    # Looser sanity check against full-f32 math (bf16 MXU error budget).
    ref_f = reference_forward_f32(x, params)
    assert jnp.allclose(out, ref_f, atol=5e-2, rtol=5e-2), (
        float(jnp.max(jnp.abs(out - ref_f)))
    )
    print("KERNEL_OK")
</pallas_src>

<mosaic_0001>
module attributes {stable_mosaic.version = 11 : i64} {
  func.func @_disc_kernel(%arg0: i32, %arg1: memref<32x784xf32, #tpu.memory_space<vmem>>, %arg2: memref<784x256xbf16, #tpu.memory_space<vmem>>, %arg3: memref<1x256xf32, #tpu.memory_space<vmem>>, %arg4: memref<256x256xbf16, #tpu.memory_space<vmem>>, %arg5: memref<1x256xf32, #tpu.memory_space<vmem>>, %arg6: memref<1x256xf32, #tpu.memory_space<vmem>>, %arg7: memref<1x1xf32, #tpu.memory_space<vmem>>, %arg8: memref<32x1xf32, #tpu.memory_space<vmem>>) attributes {dimension_semantics = [#tpu.dimension_semantics<parallel>], iteration_bounds = array<i64: 2>, scalar_prefetch = 0 : i64, scratch_operands = 0 : i64, tpu.core_type = #tpu.core_type<tc>, window_params = [{transform_indices = @transform_0, window_bounds = array<i64: 32, 784>}, {pipeline_mode = #tpu.pipeline_mode<synchronous>, transform_indices = @transform_1, window_bounds = array<i64: 784, 256>}, {pipeline_mode = #tpu.pipeline_mode<synchronous>, transform_indices = @transform_2, window_bounds = array<i64: 1, 256>}, {pipeline_mode = #tpu.pipeline_mode<synchronous>, transform_indices = @transform_3, window_bounds = array<i64: 256, 256>}, {pipeline_mode = #tpu.pipeline_mode<synchronous>, transform_indices = @transform_4, window_bounds = array<i64: 1, 256>}, {pipeline_mode = #tpu.pipeline_mode<synchronous>, transform_indices = @transform_5, window_bounds = array<i64: 1, 256>}, {pipeline_mode = #tpu.pipeline_mode<synchronous>, transform_indices = @transform_6, window_bounds = array<i64: 1, 1>}, {transform_indices = @transform_7, window_bounds = array<i64: 32, 1>}]} {
    %c0 = arith.constant 0 : index
    %c0_0 = arith.constant 0 : index
    %0 = vector.load %arg1[%c0, %c0_0] : memref<32x784xf32, #tpu.memory_space<vmem>>, vector<32x784xf32>
    %1 = arith.truncf %0 : vector<32x784xf32> to vector<32x784xbf16>
    %c0_1 = arith.constant 0 : index
    %c0_2 = arith.constant 0 : index
    %2 = vector.load %arg2[%c0_1, %c0_2] : memref<784x256xbf16, #tpu.memory_space<vmem>>, vector<784x256xbf16>
    %cst = arith.constant dense<0.000000e+00> : vector<32x256xf32>
    %3 = tpu.matmul %1, %2, %cst {dimension_numbers = #tpu.dot_dimension_numbers<[1], [0], [0], [1], [0, 0, 1, 1], [], []>} : vector<32x784xbf16>, vector<784x256xbf16>, vector<32x256xf32> -> vector<32x256xf32>
    %c0_3 = arith.constant 0 : index
    %c0_4 = arith.constant 0 : index
    %4 = vector.load %arg3[%c0_3, %c0_4] : memref<1x256xf32, #tpu.memory_space<vmem>>, vector<1x256xf32>
    %5 = vector.broadcast %4 : vector<1x256xf32> to vector<32x256xf32>
    %6 = arith.addf %3, %5 : vector<32x256xf32>
    %cst_5 = arith.constant 0.000000e+00 : f32
    %7 = vector.broadcast %cst_5 : f32 to vector<32x256xf32>
    %8 = arith.maximumf %6, %7 : vector<32x256xf32>
    %9 = arith.truncf %8 : vector<32x256xf32> to vector<32x256xbf16>
    %c0_6 = arith.constant 0 : index
    %c0_7 = arith.constant 0 : index
    %10 = vector.load %arg4[%c0_6, %c0_7] : memref<256x256xbf16, #tpu.memory_space<vmem>>, vector<256x256xbf16>
    %cst_8 = arith.constant dense<0.000000e+00> : vector<32x256xf32>
    %11 = tpu.matmul %9, %10, %cst_8 {dimension_numbers = #tpu.dot_dimension_numbers<[1], [0], [0], [1], [0, 0, 1, 1], [], []>} : vector<32x256xbf16>, vector<256x256xbf16>, vector<32x256xf32> -> vector<32x256xf32>
    %c0_9 = arith.constant 0 : index
    %c0_10 = arith.constant 0 : index
    %12 = vector.load %arg5[%c0_9, %c0_10] : memref<1x256xf32, #tpu.memory_space<vmem>>, vector<1x256xf32>
    %13 = vector.broadcast %12 : vector<1x256xf32> to vector<32x256xf32>
    %14 = arith.addf %11, %13 : vector<32x256xf32>
    %cst_11 = arith.constant 0.000000e+00 : f32
    %15 = vector.broadcast %cst_11 : f32 to vector<32x256xf32>
    %16 = arith.maximumf %14, %15 : vector<32x256xf32>
    %c0_12 = arith.constant 0 : index
    %c0_13 = arith.constant 0 : index
    %17 = vector.load %arg6[%c0_12, %c0_13] : memref<1x256xf32, #tpu.memory_space<vmem>>, vector<1x256xf32>
    %18 = vector.broadcast %17 : vector<1x256xf32> to vector<32x256xf32>
    %19 = arith.mulf %16, %18 : vector<32x256xf32>
    %cst_14 = arith.constant dense<0.000000e+00> : vector<32xf32>
    %20 = vector.multi_reduction <add>, %19, %cst_14 [1] : vector<32x256xf32> to vector<32xf32>
    %21 = vector.shape_cast %20 : vector<32xf32> to vector<32x1xf32>
    %c0_15 = arith.constant 0 : index
    %c0_16 = arith.constant 0 : index
    %22 = vector.load %arg7[%c0_15, %c0_16] : memref<1x1xf32, #tpu.memory_space<vmem>>, vector<1x1xf32>
    %23 = vector.broadcast %22 : vector<1x1xf32> to vector<32x1xf32>
    %24 = arith.addf %21, %23 : vector<32x1xf32>
    %25 = arith.negf %24 : vector<32x1xf32>
    %26 = math.exp %25 : vector<32x1xf32>
    %cst_17 = arith.constant 1.000000e+00 : f32
    %27 = vector.broadcast %cst_17 : f32 to vector<32x1xf32>
    %28 = arith.addf %27, %26 : vector<32x1xf32>
    %29 = arith.divf %27, %28 : vector<32x1xf32>
    %c0_18 = arith.constant 0 : index
    %c0_19 = arith.constant 0 : index
    %30 = vector.load %arg8[%c0_18, %c0_19] : memref<32x1xf32, #tpu.memory_space<vmem>>, vector<32x1xf32>
    tpu.vector_store %arg8[%c0_18, %c0_19], %29 {strides = array<i32>} : memref<32x1xf32, #tpu.memory_space<vmem>>, vector<32x1xf32>,
    return
  }
  func.func @transform_0(%arg0: i32) -> (i32, i32) {
    %c0_i32 = arith.constant 0 : i32
    %c0_i32_0 = arith.constant 0 : i32
    return %arg0, %c0_i32 : i32, i32
  }
  func.func @transform_1(%arg0: i32) -> (i32, i32) {
    %c0_i32 = arith.constant 0 : i32
    %c0_i32_0 = arith.constant 0 : i32
    %c0_i32_1 = arith.constant 0 : i32
    return %c0_i32, %c0_i32_0 : i32, i32
  }
  func.func @transform_2(%arg0: i32) -> (i32, i32) {
    %c0_i32 = arith.constant 0 : i32
    %c0_i32_0 = arith.constant 0 : i32
    %c0_i32_1 = arith.constant 0 : i32
    return %c0_i32, %c0_i32_0 : i32, i32
  }
  func.func @transform_3(%arg0: i32) -> (i32, i32) {
    %c0_i32 = arith.constant 0 : i32
    %c0_i32_0 = arith.constant 0 : i32
    %c0_i32_1 = arith.constant 0 : i32
    return %c0_i32, %c0_i32_0 : i32, i32
  }
  func.func @transform_4(%arg0: i32) -> (i32, i32) {
    %c0_i32 = arith.constant 0 : i32
    %c0_i32_0 = arith.constant 0 : i32
    %c0_i32_1 = arith.constant 0 : i32
    return %c0_i32, %c0_i32_0 : i32, i32
  }
  func.func @transform_5(%arg0: i32) -> (i32, i32) {
    %c0_i32 = arith.constant 0 : i32
    %c0_i32_0 = arith.constant 0 : i32
    %c0_i32_1 = arith.constant 0 : i32
    return %c0_i32, %c0_i32_0 : i32, i32
  }
  func.func @transform_6(%arg0: i32) -> (i32, i32) {
    %c0_i32 = arith.constant 0 : i32
    %c0_i32_0 = arith.constant 0 : i32
    %c0_i32_1 = arith.constant 0 : i32
    return %c0_i32, %c0_i32_0 : i32, i32
  }
  func.func @transform_7(%arg0: i32) -> (i32, i32) {
    %c0_i32 = arith.constant 0 : i32
    %c0_i32_0 = arith.constant 0 : i32
    return %arg0, %c0_i32 : i32, i32
  }
}

</mosaic_0001>

<bundles_post_ra>
// kernel: discriminator_forward.1
= control target key start
LH: loop header
LB: loop body
LE: loop exit
PB: predicated region body
PF: predicated region fallthrough
CT: control target
= control target key end

     0   :  { %s2813_s0 = inlined_call_operand.hbm [shape: f32[48,784], index: 0, kind: input, shape index: {}]   ;;  %s2814_s1 = inlined_call_operand.hbm [shape: bf16[784,256], index: 1, kind: input, shape index: {}]   ;;  %s2815_s2 = inlined_call_operand.vmem [shape: f32[1,256], index: 2, kind: input, shape index: {}]   ;;  %s2816_s3 = inlined_call_operand.hbm [shape: bf16[256,256], index: 3, kind: input, shape index: {}]   ;;  %s2817_s4 = inlined_call_operand.vmem [shape: f32[1,256], index: 4, kind: input, shape index: {}]   ;;  %s2818_s5 = inlined_call_operand.vmem [shape: f32[1,256], index: 5, kind: input, shape index: {}]   ;;  %s2819_s6 = inlined_call_operand.<no memory space> [shape: f32[1,1], index: 6, kind: input, shape index: {}]   ;;  %s2820_s7 = inlined_call_operand.vmem [shape: f32[48,1], index: 7, kind: output, shape index: {}]  }
   0x1   :  { %v12_v0 = vstv %s2819_s6 }
   0x2   :  { %13 = vst [vmem:[#allocation2] sm:$0x1] %v12_v0 }
   0x3   :  { %14 = vsyncpa [#allocation4], 0 }
   0x4   :  { %16 = vsyncpa [#allocation4 + $0x1], 0 }
   0x5   :  { %17 = vsyncpa [#allocation6], 0  ;;  %s2555_s26 = smov 0   ;;  %s2557_s27 = smov 0  }
   0x6   :  { %s2559_s28 = smov 0   ;;  %s2561_s29 = smov 0  }
   0x7 LB: > { %s2574_s6 = sadd.s32 4294967295, %s2470_s29   ;;  %s2577_s30 = sadd.s32 1, %s2470_s29   ;;  %s2470_s29 = sphi %s2561_s29, %s2838_s29   ;;  %s2466_s28 = sphi %s2559_s28, %s2837_s28   ;;  %s2462_s27 = sphi %s2557_s27, %s2836_s27   ;;  %s2458_s26 = sphi %s2555_s26, %s2835_s26  }
   0x8   : > { %s27_s8 = ssub.s32 %s2470_s29, %s2577_s30  ;;  %s30_s9 = sadd.s32 1, %s2466_s28 }
   0x9   : > { %p28_p0 = scmp.eq.s32.totalorder %s27_s8, 0  ;;  %p37_p1 = scmp.ne.s32.totalorder %s2466_s28, %s2462_s27 }
   0xa   : > { %p38_p2 = scmp.eq.s32.totalorder %s2470_s29, 0  ;;  %p43_p3 = scmp.ne.s32.totalorder %s2462_s27, %s2458_s26 }
   0xb   : > { %s2587_s10 = scalar_select %p28_p0, %s2466_s28, %s30_s9  }
   0xc   : > { %p2589_p4 = por %p38_p2, %p37_p1  ;;  %p2821_p5 = scmp.eq.s32.totalorder %s2574_s6, 0 }
   0xd   : > { %p193_p6 = scmp.eq.s32.totalorder %s2574_s6, 1  ;;  %p1813_p7 = scmp.ge.s32.totalorder %s2470_s29, 1 }
   0xe   : > { %p2598_p8 = por %p2821_p5, %p43_p3  ;;  %p206_p9 = scmp.lt.s32.totalorder %s2470_s29, 3 }
   0xf   : > { %p2603_p10 = por %p193_p6, %p37_p1  ;;  %s2504_s15 = smov [#allocation5]  }
  0x10   : > { %s2824_s12 = scalar_select %p2598_p8, 1, 0 }
  0x11   : > { %s2825_s13 = scalar_select %p2603_p10, 1, 0 }
  0x12   : > { %p2607_p11 = pnand %p1813_p7, %p206_p9  ;;  %s218_s16 = sshll.u32 %s2504_s15, 4  ;;  %s219_s16 = int_to_ptr.vmem [resolvable:$true] %s218_s16 }
  0x13   : > { %s2505_s18 = smov [#allocation7]   ;;  %s2333_s20 = scalar_lea.vmem %s219_s16, 12544 }
  0x14   : > { %p1997_p12 = pneg %p2607_p11  ;;  %s234_s19 = sshll.u32 %s2505_s18, 4  ;;  %s235_s19 = int_to_ptr.vmem [resolvable:$true] %s234_s19 }
  0x15   : > { %p2334_p1 = scmp.ne.s32.totalorder %s219_s16, %s2333_s20  ;;  %p2341_p6 = scmp.lt.s32.totalorder %s219_s16, %s219_s16 }
  0x16   : > { %p2615_p13 = pnand %p1997_p12, %p2821_p5  ;;  %p2342_p7 = scmp.lt.s32.totalorder %s2333_s20, %s2333_s20 }
  0x18   : > { %p2324_p0 = pneg %p2615_p13  ;;  %p2343_p9 = por %p2342_p7, %p2341_p6 }
  0x1a   : > { %p2336_p2 = pnand %p2334_p1, %p2324_p0 }
  0x1c   : > { %p2337_p3 = pneg %p2336_p2 }
  0x1e   : > { %p2344_p12 = pnand %p2343_p9, %p2337_p3 }
  0x20   : > { %2347 = shalt.err (!%p2344_p12)
}
  0x21   : > { %s2506_s21 = smov 128   ;;  %s2507_s22 = smov 8  }
  0x22   : > { %2000 = dma.hbm_to_vmem [thread:$0]  (!%p2615_p13), %s2814_s1, 12544, %s219_s16, [#allocation6], %s2506_s21, %s2506_s21, %s2507_s22  }
  0x23   : > { %s2359_s25 = scalar_lea.vmem %s235_s19, 4096  ;;  %p2367_p10 = scmp.lt.s32.totalorder %s235_s19, %s235_s19 }
  0x24   : > { %p2360_p5 = scmp.ne.s32.totalorder %s235_s19, %s2359_s25  ;;  %p2368_p8 = scmp.lt.s32.totalorder %s2359_s25, %s2359_s25 }
  0x26   : > { %p2362_p1 = pnand %p2360_p5, %p2324_p0  ;;  %p2369_p6 = por %p2368_p8, %p2367_p10 }
  0x28   : > { %p2363_p2 = pneg %p2362_p1 }
  0x2a   : > { %p2370_p3 = pnand %p2369_p6, %p2363_p2 }
  0x2c   : > { %2373 = shalt.err (!%p2370_p3)
}
  0x2d   : > { %2003 = dma.hbm_to_vmem [thread:$0]  (!%p2615_p13), %s2816_s3, 4096, %s235_s19, [#allocation6], %s2506_s21, %s2506_s21, %s2507_s22  }
  0x2e   : > { %p1816_p7 = scmp.ge.s32.totalorder %s2470_s29, 2 }
  0x30   : > { %253 = sbr.rel (%p1816_p7) target bundleno = 87 (0x57), region = 40 }
  0x35   : > { %256 = sbr.rel (!%p2589_p4) target bundleno = 87 (0x57), region = 44  ;;  %s257_s9 = sand.u32 (%p2589_p4), 1, %s2466_s28  }
  0x36   : > { %s1817_s15 = sshll.u32 (%p2589_p4), %s2470_s29, 2  ;;  %s1985_s16 = smul.u32 (%p2589_p4), 224, %s257_s9 }
  0x37   : > { %s263_s18 = ssub.s32 (%p2589_p4), 6, %s1817_s15  ;;  %s2645_s23 = scalar_lea.sflag (%p2589_p4), [#allocation4], %s257_s9 }
  0x38   : > { %p264_p5 = scmp.lt.s32.totalorder (%p2589_p4), %s263_s18, 4  ;;  %s261_s19 = scalar_lea.vmem (%p2589_p4), [#allocation3], %s1985_s16 }
  0x3a   : > { %s2840_s18 = smov (!%p264_p5, %s263_s18), 4 }
  0x3b   : > { %s2642_s20 = smul.u32 896, %s2840_s18 }
  0x3d   : > { %s269_s17 = ssub.s32 3584, %s2642_s20 }
  0x3e   : > { %270 = vsyncadd %s2645_s23, %s269_s17  ;;  %p1820_p4 = scmp.ne.s32.totalorder %s2642_s20, 0  ;;  %s1986_s11 = smul.u32 3584, %s2470_s29 }
  0x3f   : > { %s276_s21 = sshll.u32 %s261_s19, 4  ;;  %s2378_s29 = scalar_lea.hbm %s2813_s0, 5376  ;;  %s2655_s21 = int_to_ptr.vmem [resolvable:$true] %s276_s21 }
  0x40   : > { %s2653_s25 = scalar_lea.hbm %s2813_s0, %s1986_s11 }
  0x41   : > { %s2374_s26 = scalar_lea.hbm %s2653_s25, %s2642_s20  ;;  %p2379_p0 = scmp.lt.s32.totalorder %s2653_s25, %s2813_s0 }
  0x42   : > { %p2375_p8 = scmp.ne.s32.totalorder %s2653_s25, %s2374_s26  ;;  %p2380_p9 = scmp.lt.s32.totalorder %s2378_s29, %s2374_s26 }
  0x44   : > { %p2376_p10 = pnand %p2375_p8, %p1820_p4  ;;  %p2381_p12 = por %p2380_p9, %p2379_p0 }
  0x46   : > { %p2377_p13 = pneg %p2376_p10 }
  0x48   : > { %p2382_p1 = pnand %p2381_p12, %p2377_p13 }
  0x4a   : > { %2385 = shalt.err (!%p2382_p1)
}
  0x4b   : > { %s2386_s18 = scalar_lea.vmem %s2655_s21, %s2642_s20  ;;  %s2508_s17 = smov [#allocation3]  }
  0x4c   : > { %p2387_p2 = scmp.ne.s32.totalorder %s2655_s21, %s2386_s18  ;;  %s2390_s19 = sshll.u32 %s2508_s17, 4  ;;  %s2391_s19 = int_to_ptr.vmem [resolvable:$false] %s2390_s19 }
  0x4d   : > { %s2392_s11 = scalar_lea.vmem %s2391_s19, 7168  ;;  %p2393_p7 = scmp.lt.s32.totalorder %s2655_s21, %s2391_s19 }
  0x4e   : > { %p2388_p6 = pnand %p2387_p2, %p1820_p4  ;;  %p2394_p5 = scmp.lt.s32.totalorder %s2392_s11, %s2386_s18 }
  0x50   : > { %p2389_p3 = pneg %p2388_p6  ;;  %p2395_p8 = por %p2394_p5, %p2393_p7 }
  0x52   : > { %p2396_p10 = pnand %p2395_p8, %p2389_p3 }
  0x54   : > { %2399 = shalt.err (!%p2396_p10)
}
  0x55   : > { %s2509_s22 = smov 896   ;;  %s2510_s24 = smov 56  }
  0x56   : > { %282 = dma.hbm_to_vmem [thread:$0]  (%p1820_p4), %s2653_s25, %s2642_s20, %s2655_s21, %s2645_s23, %s2509_s22, %s2509_s22, %s2510_s24  }
  0x57 PF: > { %288 = sbr.rel (%p2607_p11) target bundleno = 860 (0x35c), region = 48  ;;  %s2684_s26 = sand.u32 (!%p2607_p11), 1, %s2462_s27  }
  0x58   : > { %s1987_s8 = smul.u32 (!%p2607_p11), 224, %s2684_s26  ;;  %s291_s9 = scalar_lea.sflag (!%p2607_p11), [#allocation4], %s2684_s26 }
  0x59   : > { %p2828_p13 = scmp.ne.s32.totalorder (!%p2607_p11), %s2824_s12, 0 }
  0x5a   : > { %s2688_s29 = scalar_lea.vmem (!%p2607_p11), [#allocation3], %s1987_s8 }
  0x5c   : > { %2449 = dma.done.wait (%p2828_p13), %s291_s9, 3584  }
  0x5d   : > { %2451 = vsyncadd (%p2828_p13), %s291_s9, 4294963712  ;;  %p2829_p4 = scmp.eq.s32.totalorder %s2574_s6, 0 }
  0x5f   : > { %2453 = dma.done.wait (%p2829_p4), [#allocation6], 16640   ;;  %p2830_p11 = pmov %p2829_p4 }
  0x60   : > { %v2111_v1 = vld [vmem:[#allocation5 + $0x74] ss:$8 sps:$4 sm:$0xff]   ;;  %v2113_v2 = vld [vmem:[#allocation5 + $0x70] ss:$8 sps:$4 sm:$0xff]   ;;  %v2117_v5 = vld [vmem:[#allocation5 + $0x64] ss:$8 sps:$4 sm:$0xff]  }
  0x61   : > { %2455 = vsyncadd (%p2830_p11), [#allocation6], 4294950656  ;;  %993 = vmatprep.subr.bf16.mxu0 %v2111_v1  ;;  %v2114_v3 = vld [vmem:[#allocation5 + $0x174] ss:$8 sps:$4 sm:$0xff]   ;;  %v2116_v4 = vld [vmem:[#allocation5 + $0x170] ss:$8 sps:$4 sm:$0xff]  }
  0x62   : > { %994 = vmatpush1.bf16.msra.mxu0 %v2113_v2  ;;  %v2119_v6 = vld [vmem:[#allocation5 + $0x60] ss:$8 sps:$4 sm:$0xff]   ;;  %1046 = vmatprep.subr.bf16.mxu1 %v2114_v3  ;;  %v2120_v7 = vld [vmem:[#allocation5 + $0x164] ss:$8 sps:$4 sm:$0xff]   ;;  %v2123_v9 = vld [vmem:[#allocation5 + $0x54] ss:$8 sps:$4 sm:$0xff]  }
  0x63   : > { %1047 = vmatpush1.bf16.msra.mxu1 %v2116_v4  ;;  %995 = vmatprep.subr.bf16.mxu0 %v2117_v5  ;;  %v2122_v8 = vld [vmem:[#allocation5 + $0x160] ss:$8 sps:$4 sm:$0xff]   ;;  %v2125_v10 = vld [vmem:[#allocation5 + $0x50] ss:$8 sps:$4 sm:$0xff]   ;;  %v2126_v11 = vld [vmem:[#allocation5 + $0x154] ss:$8 sps:$4 sm:$0xff]  }
  0x64   : > { %1048 = vmatprep.subr.bf16.mxu1 %v2120_v7  ;;  %v2129_v12 = vld [vmem:[#allocation5 + $0x44] ss:$8 sps:$4 sm:$0xff]   ;;  %v2128_v13 = vld [vmem:[#allocation5 + $0x150] ss:$8 sps:$4 sm:$0xff]   ;;  %v2131_v15 = vld [vmem:[#allocation5 + $0x40] ss:$8 sps:$4 sm:$0xff]  }
  0x65   : > { %v2132_v14 = vld [vmem:[#allocation5 + $0x144] ss:$8 sps:$4 sm:$0xff]   ;;  %v2135_v16 = vld [vmem:[#allocation5 + $0x34] ss:$8 sps:$4 sm:$0xff]   ;;  %v2134_v17 = vld [vmem:[#allocation5 + $0x140] ss:$8 sps:$4 sm:$0xff]  }
  0x66   : > { %996 = vmatpush1.bf16.msra.mxu0 %v2119_v6  ;;  %v2138_v18 = vld [vmem:[#allocation5 + $0x134] ss:$8 sps:$4 sm:$0xff]   ;;  %v2137_v19 = vld [vmem:[#allocation5 + $0x30] ss:$8 sps:$4 sm:$0xff]   ;;  %v2141_v20 = vld [vmem:[#allocation5 + $0x24] ss:$8 sps:$4 sm:$0xff]  }
  0x67   : > { %997 = vmatprep.subr.bf16.mxu0 %v2123_v9  ;;  %1049 = vmatpush1.bf16.msra.mxu1 %v2122_v8  ;;  %v2140_v21 = vld [vmem:[#allocation5 + $0x130] ss:$8 sps:$4 sm:$0xff]   ;;  %v2144_v22 = vld [vmem:[#allocation5 + $0x124] ss:$8 sps:$4 sm:$0xff]   ;;  %v2143_v23 = vld [vmem:[#allocation5 + $0x20] ss:$8 sps:$4 sm:$0xff]  }
  0x68   : > { %1050 = vmatprep.subr.bf16.mxu1 %v2126_v11  ;;  %v2147_v24 = vld [vmem:[#allocation5 + $0x14] ss:$8 sps:$4 sm:$0xff]   ;;  %v2146_v25 = vld [vmem:[#allocation5 + $0x120] ss:$8 sps:$4 sm:$0xff]   ;;  %v2149_v27 = vld [vmem:[#allocation5 + $0x10] ss:$8 sps:$4 sm:$0xff]  }
  0x69   : > { %v2150_v26 = vld [vmem:[#allocation5 + $0x114] ss:$8 sps:$4 sm:$0xff]   ;;  %v2153_v28 = vld [vmem:[#allocation5 + $0x4] ss:$8 sps:$4 sm:$0xff]   ;;  %v2152_v29 = vld [vmem:[#allocation5 + $0x110] ss:$8 sps:$4 sm:$0xff]  }
  0x6a   : > { %998 = vmatpush1.bf16.msra.mxu0 %v2125_v10  ;;  %v2156_v30 = vld [vmem:[#allocation5 + $0x104] ss:$8 sps:$4 sm:$0xff]   ;;  %v2155_v31 = vld [vmem:[#allocation5] ss:$8 sps:$4 sm:$0xff]   ;;  %v2159_v32 = vld [vmem:[#allocation5 + $0xf4] ss:$8 sps:$4 sm:$0xff]  }
  0x6b   : > { %999 = vmatprep.subr.bf16.mxu0 %v2129_v12  ;;  %1051 = vmatpush1.bf16.msra.mxu1 %v2128_v13  ;;  %v2158_v33 = vld [vmem:[#allocation5 + $0x100] ss:$8 sps:$4 sm:$0xff]   ;;  %v2162_v34 = vld [vmem:[#allocation5 + $0x1f4] ss:$8 sps:$4 sm:$0xff]   ;;  %v2161_v35 = vld [vmem:[#allocation5 + $0xf0] ss:$8 sps:$4 sm:$0xff]  }
  0x6c   : > { %1052 = vmatprep.subr.bf16.mxu1 %v2132_v14  ;;  %v2165_v36 = vld [vmem:[#allocation5 + $0xe4] ss:$8 sps:$4 sm:$0xff]   ;;  %v2164_v37 = vld [vmem:[#allocation5 + $0x1f0] ss:$8 sps:$4 sm:$0xff]   ;;  %v2167_v39 = vld [vmem:[#allocation5 + $0xe0] ss:$8 sps:$4 sm:$0xff]  }
  0x6d   : > { %v2168_v38 = vld [vmem:[#allocation5 + $0x1e4] ss:$8 sps:$4 sm:$0xff]   ;;  %v2171_v40 = vld [vmem:[#allocation5 + $0xd4] ss:$8 sps:$4 sm:$0xff]   ;;  %v2170_v41 = vld [vmem:[#allocation5 + $0x1e0] ss:$8 sps:$4 sm:$0xff]  }
  0x6e   : > { %1000 = vmatpush1.bf16.msra.mxu0 %v2131_v15  ;;  %v2174_v42 = vld [vmem:[#allocation5 + $0x1d4] ss:$8 sps:$4 sm:$0xff]   ;;  %v2173_v43 = vld [vmem:[#allocation5 + $0xd0] ss:$8 sps:$4 sm:$0xff]   ;;  %v2177_v44 = vld [vmem:[#allocation5 + $0xc4] ss:$8 sps:$4 sm:$0xff]  }
  0x6f   : > { %1001 = vmatprep.subr.bf16.mxu0 %v2135_v16  ;;  %1053 = vmatpush1.bf16.msra.mxu1 %v2134_v17  ;;  %v2176_v45 = vld [vmem:[#allocation5 + $0x1d0] ss:$8 sps:$4 sm:$0xff]   ;;  %v2180_v46 = vld [vmem:[#allocation5 + $0x1c4] ss:$8 sps:$4 sm:$0xff]   ;;  %v2179_v49 = vld [vmem:[#allocation5 + $0xc0] ss:$8 sps:$4 sm:$0xff]  }
  0x70   : > { %1054 = vmatprep.subr.bf16.mxu1 %v2138_v18  ;;  %v345_v47 = vld [vmem:[%s2688_s29 + $0x8] sm:$0xff]  ;;  %v352_v48 = vld [vmem:[%s2688_s29 + $0x40] sm:$0xff]  ;;  %v2183_v51 = vld [vmem:[#allocation5 + $0xb4] ss:$8 sps:$4 sm:$0xff]   ;;  %vm986_vm0 = vcmask 130048   ;;  %s1827_s15 = sshll.u32 %s2684_s26, 5 }
  0x71   : > { %v373_v50 = vpack.c.bf16 %v352_v48, %v345_v47  ;;  %v2182_v52 = vld [vmem:[#allocation5 + $0x1c0] ss:$8 sps:$4 sm:$0xff]   ;;  %v347_v53 = vld [vmem:[%s2688_s29 + $0x18] sm:$0xff]  ;;  %v354_v54 = vld [vmem:[%s2688_s29 + $0x50] sm:$0xff]  ;;  %vm1549_vm1 = vcmask 7168   ;;  %s2748_s16 = scalar_lea.vmem [#allocation8], %s1827_s15  }
  0x72   : > { %1002 = vmatpush1.bf16.msra.mxu0 %v2137_v19  ;;  %v2186_v55 = vld [vmem:[#allocation5 + $0x1b4] ss:$8 sps:$4 sm:$0xff]   ;;  %v375_v56 = vpack.c.bf16 %v354_v54, %v347_v53  ;;  %v2185_v57 = vld [vmem:[#allocation5 + $0xb0] ss:$8 sps:$4 sm:$0xff]   ;;  %v2189_v58 = vld [vmem:[#allocation5 + $0xa4] ss:$8 sps:$4 sm:$0xff]  }
  0x73   : > { %1003 = vmatprep.subr.bf16.mxu0 %v2141_v20  ;;  %1055 = vmatpush1.bf16.msra.mxu1 %v2140_v21  ;;  %v2188_v59 = vld [vmem:[#allocation5 + $0x1b0] ss:$8 sps:$4 sm:$0xff]   ;;  %v2192_v60 = vld [vmem:[#allocation5 + $0x1a4] ss:$8 sps:$4 sm:$0xff]   ;;  %v2191_v61 = vld [vmem:[#allocation5 + $0xa0] ss:$8 sps:$4 sm:$0xff]  }
  0x74   : > { %1056 = vmatprep.subr.bf16.mxu1 %v2144_v22  ;;  %1025 = vmatprep.mubr.bf16.mxu0 %v373_v50  ;;  %v2195_v62 = vld [vmem:[#allocation5 + $0x94] ss:$8 sps:$4 sm:$0xff]   ;;  %v2194_v63 = vld [vmem:[#allocation5 + $0x1a0] ss:$8 sps:$4 sm:$0xff]   ;;  %v2197_v1 = vld [vmem:[#allocation5 + $0x90] ss:$8 sps:$4 sm:$0xff]  }
  0x75   : > { %1078 = vmatprep.mubr.bf16.mxu1 %v375_v56  ;;  %v2198_v0 = vld [vmem:[#allocation5 + $0x194] ss:$8 sps:$4 sm:$0xff]   ;;  %v2200_v2 = vld [vmem:[#allocation5 + $0x190] ss:$8 sps:$4 sm:$0xff]   ;;  %v2201_v3 = vld [vmem:[#allocation5 + $0x84] ss:$8 sps:$4 sm:$0xff]  }
  0x76   : > { %1004 = vmatpush1.bf16.msra.mxu0 %v2143_v23  ;;  %v2203_v4 = vld [vmem:[#allocation5 + $0x80] ss:$8 sps:$4 sm:$0xff]   ;;  %v2204_v5 = vld [vmem:[#allocation5 + $0x184] ss:$8 sps:$4 sm:$0xff]   ;;  %v351_v8 = vld [vmem:[%s2688_s29 + $0x38] sm:$0xff]  ;;  %p2831_p0 = scmp.ne.s32.totalorder %s2825_s13, 0 }
  0x77   : > { %1005 = vmatprep.subr.bf16.mxu0 %v2147_v24  ;;  %1057 = vmatpush1.bf16.msra.mxu1 %v2146_v25  ;;  %v344_v6 = vld [vmem:[%s2688_s29] sm:$0xff]  ;;  %v2209_v9 = vld [vmem:[#allocation5 + $0x274] ss:$8 sps:$4 sm:$0xff]   ;;  %v353_v11 = vld [vmem:[%s2688_s29 + $0x48] sm:$0xff]  ;;  %s1966_s18 = sshll.u32 (%p2831_p0), %s2574_s6, 2  ;;  %s1982_s17 = sshll.u32 (%p2831_p0), %s2574_s6, 5 }
  0x78   : > { %1058 = vmatprep.subr.bf16.mxu1 %v2150_v26  ;;  %v2206_v7 = vld [vmem:[#allocation5 + $0x180] ss:$8 sps:$4 sm:$0xff]   ;;  %v346_v10 = vld [vmem:[%s2688_s29 + $0x10] sm:$0xff]  ;;  %v372_v12 = vpack.c.bf16 %v351_v8, %v344_v6  ;;  %v359_v14 = vld [vmem:[%s2688_s29 + $0x78] sm:$0xff]  ;;  %s1562_s19 = ssub.s32 (%p2831_p0), 6, %s1966_s18  ;;  %s2761_s24 = scalar_lea.vmem (%p2831_p0), %s2820_s7, %s1982_s17  }
  0x79   : > { %v2207_v13 = vld [vmem:[#allocation5 + $0x270] ss:$8 sps:$4 sm:$0xff]   ;;  %v374_v16 = vpack.c.bf16 %v353_v11, %v346_v10  ;;  %v2212_v17 = vld [vmem:[#allocation5 + $0x264] ss:$8 sps:$4 sm:$0xff]   ;;  %v2246_v20 = vld [vmem:[#allocation5 + $0x300] ss:$8 sps:$4 sm:$0xff]  }
  0x7a   : > { %1006 = vmatpush1.bf16.msra.mxu0 %v2149_v27  ;;  %v366_v15 = vld [vmem:[%s2688_s29 + $0xb0] sm:$0xff]  ;;  %v2248_v19 = vld [vmem:[#allocation5 + $0x304] ss:$8 sps:$4 sm:$0xff]   ;;  %v2210_v23 = vld [vmem:[#allocation5 + $0x260] ss:$8 sps:$4 sm:$0xff]   ;;  %p1563_p9 = scmp.lt.s32.totalorder (%p2831_p0), %s1562_s19, 4 }
  0x7b   : > { %1007 = vmatprep.subr.bf16.mxu0 %v2153_v28  ;;  %1059 = vmatpush1.bf16.msra.mxu1 %v2152_v29  ;;  %v380_v18 = vpack.c.bf16 %v366_v15, %v359_v14  ;;  %v361_v21 = vld [vmem:[%s2688_s29 + $0x88] sm:$0xff]  ;;  %v368_v22 = vld [vmem:[%s2688_s29 + $0xc0] sm:$0xff]  ;;  %v2215_v24 = vld [vmem:[#allocation5 + $0x254] ss:$8 sps:$4 sm:$0xff]  }
  0x7c   : > { %1060 = vmatprep.subr.bf16.mxu1 %v2156_v30  ;;  %v382_v25 = vpack.c.bf16 %v368_v22, %v361_v21  ;;  %v358_v26 = vld [vmem:[%s2688_s29 + $0x70] sm:$0xff]  ;;  %v365_v27 = vld [vmem:[%s2688_s29 + $0xa8] sm:$0xff]  ;;  %v360_v28 = vld [vmem:[%s2688_s29 + $0x80] sm:$0xff] }
  0x7d   : > { %v367_v29 = vld [vmem:[%s2688_s29 + $0xb8] sm:$0xff]  ;;  %v379_v30 = vpack.c.bf16 %v365_v27, %v358_v26  ;;  %v364_v47 = vld [vmem:[%s2688_s29 + $0xa0] sm:$0xff]  ;;  %v370_v8 = vld [vmem:[%s2688_s29 + $0xd0] sm:$0xff] }
  0x7e   : > { %1008 = vmatpush1.bf16.msra.mxu0 %v2155_v31  ;;  %v2213_v31 = vld [vmem:[#allocation5 + $0x250] ss:$8 sps:$4 sm:$0xff]   ;;  %v2230_v50 = vld [vmem:[#allocation5 + $0x204] ss:$8 sps:$4 sm:$0xff]   ;;  %v2233_v53 = vld [vmem:[#allocation5 + $0x2f4] ss:$8 sps:$4 sm:$0xff]  }
  0x7f   : > { %1009 = vmatprep.subr.bf16.mxu0 %v2159_v32  ;;  %1061 = vmatpush1.bf16.msra.mxu1 %v2158_v33  ;;  %v349_v32 = vld [vmem:[%s2688_s29 + $0x28] sm:$0xff]  ;;  %v356_v33 = vld [vmem:[%s2688_s29 + $0x60] sm:$0xff]  ;;  %v371_v48 = vld [vmem:[%s2688_s29 + $0xd8] sm:$0xff] }
  0x80   : > { %1062 = vmatprep.subr.bf16.mxu1 %v2162_v34  ;;  %v2218_v34 = vld [vmem:[#allocation5 + $0x244] ss:$8 sps:$4 sm:$0xff]   ;;  %v2231_v54 = vld [vmem:[#allocation5 + $0x2f0] ss:$8 sps:$4 sm:$0xff]   ;;  %v2234_v56 = vld [vmem:[#allocation5 + $0x2e0] ss:$8 sps:$4 sm:$0xff]  }
  0x81   : > { %v355_v6 = vld [vmem:[%s2688_s29 + $0x58] sm:$0xff]  ;;  %v362_v11 = vld [vmem:[%s2688_s29 + $0x90] sm:$0xff]  ;;  %v2258_v14 = vld [vmem:[#allocation7 + $0x70] ss:$8 sps:$4 sm:$0xff]  }
  0x82   : > { %1010 = vmatpush2.bf16.msra.mxu0 %v2161_v35  ;;  %v381_v35 = vpack.c.bf16 %v367_v29, %v360_v28  ;;  %v2260_v15 = vld [vmem:[#allocation7 + $0x74] ss:$8 sps:$4 sm:$0xff]   ;;  %v2267_v21 = vld [vmem:[#allocation7 + $0x40] ss:$8 sps:$4 sm:$0xff]   ;;  %v2276_v27 = vld [vmem:[#allocation7 + $0x10] ss:$8 sps:$4 sm:$0xff]  }
  0x83   : > { %1011 = vmatprep.subr.bf16.mxu0 %v2165_v36  ;;  %1063 = vmatpush2.bf16.msra.mxu1 %v2164_v37  ;;  %v377_v36 = vpack.c.bf16 %v356_v33, %v349_v32  ;;  %v2216_v37 = vld [vmem:[#allocation5 + $0x240] ss:$8 sps:$4 sm:$0xff]   ;;  %v2272_v22 = vld [vmem:[#allocation7 + $0x34] ss:$8 sps:$4 sm:$0xff]   ;;  %v2281_v28 = vld [vmem:[#allocation7 + $0x4] ss:$8 sps:$4 sm:$0xff]  }
  0x84   : > { %1064 = vmatprep.subr.bf16.mxu1 %v2168_v38  ;;  %v2221_v38 = vld [vmem:[#allocation5 + $0x234] ss:$8 sps:$4 sm:$0xff]   ;;  %v2278_v26 = vld [vmem:[#allocation7 + $0x14] ss:$8 sps:$4 sm:$0xff]   ;;  %v2279_v29 = vld [vmem:[#allocation7] ss:$8 sps:$4 sm:$0xff]  }
  0x85   : > { %v2287_v32 = vld [vmem:[#allocation7 + $0xe4] ss:$8 sps:$4 sm:$0xff]   ;;  %v2285_v33 = vld [vmem:[#allocation7 + $0xe0] ss:$8 sps:$4 sm:$0xff]  }
  0x86   : > { %1012 = vmatpush2.bf16.msra.mxu0 %v2167_v39  ;;  %v350_v39 = vld [vmem:[%s2688_s29 + $0x30] sm:$0xff] }
  0x87   : > { %1013 = vmatprep.subr.bf16.mxu0 %v2171_v40  ;;  %1065 = vmatpush2.bf16.msra.mxu1 %v2170_v41  ;;  %v357_v40 = vld [vmem:[%s2688_s29 + $0x68] sm:$0xff]  ;;  %v2219_v41 = vld [vmem:[#allocation5 + $0x230] ss:$8 sps:$4 sm:$0xff]  }
  0x88   : > { %1066 = vmatprep.subr.bf16.mxu1 %v2174_v42  ;;  %v2511_v42 = vmov 0  }
  0x8a   : > { %1014 = vmatpush2.bf16.msra.mxu0 %v2173_v43  ;;  %v2224_v43 = vld [vmem:[#allocation5 + $0x224] ss:$8 sps:$4 sm:$0xff]  }
  0x8b   : > { %1015 = vmatprep.subr.bf16.mxu0 %v2177_v44  ;;  %1067 = vmatpush2.bf16.msra.mxu1 %v2176_v45  ;;  %v378_v44 = vpack.c.bf16 %v357_v40, %v350_v39  ;;  %v2222_v45 = vld [vmem:[#allocation5 + $0x220] ss:$8 sps:$4 sm:$0xff]   ;;  %v2299_v40 = vld [vmem:[#allocation7 + $0xa4] ss:$8 sps:$4 sm:$0xff]  }
  0x8c   : > { %1068 = vmatprep.subr.bf16.mxu1 %v2180_v46  ;;  %v2227_v46 = vld [vmem:[#allocation5 + $0x214] ss:$8 sps:$4 sm:$0xff]   ;;  %v2294_v39 = vld [vmem:[#allocation7 + $0xb0] ss:$8 sps:$4 sm:$0xff]  }
  0x8e   : > { %1016 = vmatpush2.bf16.msra.mxu0 %v2179_v49  ;;  %v2225_v49 = vld [vmem:[#allocation5 + $0x210] ss:$8 sps:$4 sm:$0xff]  }
  0x8f   : > { %1017 = vmatprep.subr.bf16.mxu0 %v2183_v51  ;;  %1069 = vmatpush2.bf16.msra.mxu1 %v2182_v52  ;;  %v385_v51 = vpack.c.bf16 %v371_v48, %v364_v47  ;;  %v2228_v52 = vld [vmem:[#allocation5 + $0x200] ss:$8 sps:$4 sm:$0xff]  }
  0x90   : > { %1070 = vmatprep.subr.bf16.mxu1 %v2186_v55  ;;  %v2236_v55 = vld [vmem:[#allocation5 + $0x2e4] ss:$8 sps:$4 sm:$0xff]  }
  0x92   : > { %1018 = vmatpush2.bf16.msra.mxu0 %v2185_v57  ;;  %v2239_v57 = vld [vmem:[#allocation5 + $0x2d4] ss:$8 sps:$4 sm:$0xff]  }
  0x93   : > { %1019 = vmatprep.subr.bf16.mxu0 %v2189_v58  ;;  %1071 = vmatpush2.bf16.msra.mxu1 %v2188_v59  ;;  %v2237_v58 = vld [vmem:[#allocation5 + $0x2d0] ss:$8 sps:$4 sm:$0xff]   ;;  %v2242_v59 = vld [vmem:[#allocation5 + $0x2c4] ss:$8 sps:$4 sm:$0xff]  }
  0x94   : > { %1072 = vmatprep.subr.bf16.mxu1 %v2192_v60  ;;  %v2240_v60 = vld [vmem:[#allocation5 + $0x2c0] ss:$8 sps:$4 sm:$0xff]  }
  0x96   : > { %1020 = vmatpush2.bf16.msra.mxu0 %v2191_v61  ;;  %v2245_v61 = vld [vmem:[#allocation5 + $0x2b4] ss:$8 sps:$4 sm:$0xff]  }
  0x97   : > { %1021 = vmatprep.subr.bf16.mxu0 %v2195_v62  ;;  %1073 = vmatpush2.bf16.msra.mxu1 %v2194_v63  ;;  %v2243_v62 = vld [vmem:[#allocation5 + $0x2b0] ss:$8 sps:$4 sm:$0xff]   ;;  %v2251_v63 = vld [vmem:[#allocation5 + $0x2a4] ss:$8 sps:$4 sm:$0xff]  }
  0x98   : > { %1074 = vmatprep.subr.bf16.mxu1 %v2198_v0  ;;  %v2249_v0 = vld [vmem:[#allocation5 + $0x2a0] ss:$8 sps:$4 sm:$0xff]  }
  0x9a   : > { %1022 = vmatpush2.bf16.msra.mxu0 %v2197_v1  ;;  %v2254_v1 = vld [vmem:[#allocation5 + $0x294] ss:$8 sps:$4 sm:$0xff]  }
  0x9b   : > { %1023 = vmatprep.subr.bf16.mxu0 %v2201_v3  ;;  %1075 = vmatpush2.bf16.msra.mxu1 %v2200_v2  ;;  %v2252_v2 = vld [vmem:[#allocation5 + $0x290] ss:$8 sps:$4 sm:$0xff]   ;;  %v2257_v3 = vld [vmem:[#allocation5 + $0x284] ss:$8 sps:$4 sm:$0xff]  }
  0x9c   : > { %1076 = vmatprep.subr.bf16.mxu1 %v2204_v5  ;;  %v348_v5 = vld [vmem:[%s2688_s29 + $0x20] sm:$0xff] }
  0x9e   : > { %1024 = vmatpush2.bf16.msra.mxu0 %v2203_v4  ;;  %v2255_v4 = vld [vmem:[#allocation5 + $0x280] ss:$8 sps:$4 sm:$0xff]  }
  0x9f   : > { %1099 = vmatprep.subr.bf16.mxu0 %v2209_v9  ;;  %1077 = vmatpush2.bf16.msra.mxu1 %v2206_v7  ;;  %v363_v7 = vld [vmem:[%s2688_s29 + $0x98] sm:$0xff]  ;;  %v376_v9 = vpack.c.bf16 %v355_v6, %v348_v5 }
  0xa0   : > { %1166 = vmatprep.subr.bf16.mxu1 %v2248_v19  ;;  %v384_v10 = vpack.c.bf16 %v370_v8, %v363_v7  ;;  %v2264_v19 = vld [vmem:[#allocation7 + $0x50] ss:$8 sps:$4 sm:$0xff]  }
  0xa1   : > { %1026 = vmatmul.mubr.bf16.vlgmr.msra.gmra.mxu0 %v372_v12  ;;  %v369_v12 = vld [vmem:[%s2688_s29 + $0xc8] sm:$0xff] }
  0xa2   : > { %1100 = vmatpush1.bf16.msra.mxu0 %v2207_v13  ;;  %1035 = vmatprep.mubr.bf16.mxu0 %v380_v18  ;;  %v383_v13 = vpack.c.bf16 %v369_v12, %v362_v11  ;;  %v2266_v18 = vld [vmem:[#allocation7 + $0x54] ss:$8 sps:$4 sm:$0xff]  }
  0xa3   : > { %1079 = vmatmul.mubr.bf16.vlgmr.msra.gmra.mxu1 %v374_v16  ;;  %1101 = vmatprep.subr.bf16.mxu0 %v2212_v17  ;;  %v2263_v16 = vld [vmem:[#allocation7 + $0x64] ss:$8 sps:$4 sm:$0xff]   ;;  %v2261_v17 = vld [vmem:[#allocation7 + $0x60] ss:$8 sps:$4 sm:$0xff]  }
  0xa4   : > { %1167 = vmatpush1.bf16.msra.mxu1 %v2246_v20  ;;  %1088 = vmatprep.mubr.bf16.mxu1 %v382_v25  ;;  %v2269_v20 = vld [vmem:[#allocation7 + $0x44] ss:$8 sps:$4 sm:$0xff]   ;;  %v2273_v25 = vld [vmem:[#allocation7 + $0x20] ss:$8 sps:$4 sm:$0xff]  }
  0xa5   : > { %1421 = vmatprep.subr.bf16.mxu1 %v2260_v15 }
  0xa6   : > { %1102 = vmatpush1.bf16.msra.mxu0 %v2210_v23  ;;  %v2270_v23 = vld [vmem:[#allocation7 + $0x30] ss:$8 sps:$4 sm:$0xff]  }
  0xa7   : > { %1103 = vmatprep.subr.bf16.mxu0 %v2215_v24  ;;  %v2275_v24 = vld [vmem:[#allocation7 + $0x24] ss:$8 sps:$4 sm:$0xff]  }
  0xa9   : > { %1036 = vmatmul.mubr.bf16.gmra.mxu0 %v379_v30  ;;  %v2284_v30 = vld [vmem:[#allocation7 + $0xf4] ss:$8 sps:$4 sm:$0xff]  }
  0xaa   : > { %1104 = vmatpush1.bf16.msra.mxu0 %v2213_v31  ;;  %1131 = vmatprep.mubr.bf16.mxu0 %v377_v36  ;;  %v2282_v31 = vld [vmem:[#allocation7 + $0xf0] ss:$8 sps:$4 sm:$0xff]   ;;  %v2293_v36 = vld [vmem:[#allocation7 + $0xc4] ss:$8 sps:$4 sm:$0xff]  }
  0xab   : > { %1105 = vmatprep.subr.bf16.mxu0 %v2218_v34  ;;  %1089 = vmatmul.mubr.bf16.gmra.mxu1 %v381_v35  ;;  %v2290_v34 = vld [vmem:[#allocation7 + $0xd4] ss:$8 sps:$4 sm:$0xff]   ;;  %v2288_v35 = vld [vmem:[#allocation7 + $0xd0] ss:$8 sps:$4 sm:$0xff]  }
  0xac   : > { %1184 = vmatprep.mubr.bf16.mxu1 %v2511_v42 }
  0xae   : > { %1106 = vmatpush1.bf16.msra.mxu0 %v2216_v37  ;;  %v2291_v37 = vld [vmem:[#allocation7 + $0xc0] ss:$8 sps:$4 sm:$0xff]  }
  0xaf   : > { %1107 = vmatprep.subr.bf16.mxu0 %v2221_v38  ;;  %v2296_v38 = vld [vmem:[#allocation7 + $0xb4] ss:$8 sps:$4 sm:$0xff]  }
  0xb2   : > { %1108 = vmatpush1.bf16.msra.mxu0 %v2219_v41  ;;  %v2297_v41 = vld [vmem:[#allocation7 + $0xa0] ss:$8 sps:$4 sm:$0xff]  }
  0xb3   : > { %1109 = vmatprep.subr.bf16.mxu0 %v2224_v43  ;;  %1926 = vmatmul.mubr.msk.bf16.vlgmr.msra.gmra.mxu1 %vm986_vm0, %v378_v44  ;;  %v2300_v43 = vld [vmem:[#allocation7 + $0x90] ss:$8 sps:$4 sm:$0xff]   ;;  %v2305_v44 = vld [vmem:[#allocation7 + $0x84] ss:$8 sps:$4 sm:$0xff]  }
  0xb4   : > { %1194 = vmatprep.mubr.bf16.mxu1 %v2511_v42  ;;  %1422 = vmatpush1.bf16.msra.mxu1 %v2258_v14  ;;  %v2302_v42 = vld [vmem:[#allocation7 + $0x94] ss:$8 sps:$4 sm:$0xff]  }
  0xb5   : > { %1423 = vmatprep.subr.bf16.mxu1 %v2263_v16 }
  0xb6   : > { %1110 = vmatpush1.bf16.msra.mxu0 %v2222_v45  ;;  %v2303_v45 = vld [vmem:[#allocation7 + $0x80] ss:$8 sps:$4 sm:$0xff]  }
  0xb7   : > { %1111 = vmatprep.subr.bf16.mxu0 %v2227_v46 }
  0xb8   : > { %1424 = vmatpush1.bf16.msra.mxu1 %v2261_v17 }
  0xb9   : > { %1425 = vmatprep.subr.bf16.mxu1 %v2266_v18 }
  0xba   : > { %1112 = vmatpush1.bf16.msra.mxu0 %v2225_v49 }
  0xbb   : > { %1113 = vmatprep.subr.bf16.mxu0 %v2230_v50  ;;  %1927 = vmatmul.mubr.msk.bf16.gmra.mxu1 %vm986_vm0, %v385_v51 }
  0xbc   : > { %1426 = vmatpush1.bf16.msra.mxu1 %v2264_v19 }
  0xbd   : > { %1427 = vmatprep.subr.bf16.mxu1 %v2269_v20 }
  0xbe   : > { %1114 = vmatpush1.bf16.msra.mxu0 %v2228_v52 }
  0xbf   : > { %1115 = vmatprep.subr.bf16.mxu0 %v2233_v53 }
  0xc0   : > { %1428 = vmatpush1.bf16.msra.mxu1 %v2267_v21 }
  0xc1   : > { %1429 = vmatprep.subr.bf16.mxu1 %v2272_v22 }
  0xc2   : > { %1116 = vmatpush2.bf16.msra.mxu0 %v2231_v54 }
  0xc3   : > { %1117 = vmatprep.subr.bf16.mxu0 %v2236_v55 }
  0xc4   : > { %1430 = vmatpush1.bf16.msra.mxu1 %v2270_v23 }
  0xc5   : > { %1431 = vmatprep.subr.bf16.mxu1 %v2275_v24 }
  0xc6   : > { %1118 = vmatpush2.bf16.msra.mxu0 %v2234_v56  ;;  %v486_v56 = vlaneseq }
  0xc7   : > { %1119 = vmatprep.subr.bf16.mxu0 %v2239_v57 }
  0xc8   : > { %1432 = vmatpush1.bf16.msra.mxu1 %v2273_v25 }
  0xc9   : > { %1433 = vmatprep.subr.bf16.mxu1 %v2278_v26 }
  0xca   : > { %1120 = vmatpush2.bf16.msra.mxu0 %v2237_v58 }
  0xcb   : > { %1121 = vmatprep.subr.bf16.mxu0 %v2242_v59  ;;  %v487_v59 = vshrl.u32 %v486_v56, 7 }
  0xcc   : > { %1434 = vmatpush1.bf16.msra.mxu1 %v2276_v27 }
  0xcd   : > { %1435 = vmatprep.subr.bf16.mxu1 %v2281_v28 }
  0xce   : > { %1122 = vmatpush2.bf16.msra.mxu0 %v2240_v60 }
  0xcf   : > { %1123 = vmatprep.subr.bf16.mxu0 %v2245_v61 }
  0xd0   : > { %1436 = vmatpush1.bf16.msra.mxu1 %v2279_v29 }
  0xd1   : > { %1437 = vmatprep.subr.bf16.mxu1 %v2284_v30 }
  0xd2   : > { %1124 = vmatpush2.bf16.msra.mxu0 %v2243_v62  ;;  %v2728_v62 = vsub.s32 1, %v487_v59 }
  0xd3   : > { %1125 = vmatprep.subr.bf16.mxu0 %v2251_v63  ;;  %v484_v63 = vld [vmem:[%s2815_s2] sm:$0x3] }
  0xd4   : > { %1438 = vmatpush2.bf16.msra.mxu1 %v2282_v31 }
  0xd5   : > { %1439 = vmatprep.subr.bf16.mxu1 %v2287_v32 }
  0xd6   : > { %1126 = vmatpush2.bf16.msra.mxu0 %v2249_v0  ;;  %v2733_v0 = vsub.s32 0, %v487_v59 }
  0xd7   : > { %1127 = vmatprep.subr.bf16.mxu0 %v2254_v1 }
  0xd8   : > { %1440 = vmatpush2.bf16.msra.mxu1 %v2285_v33 }
  0xd9   : > { %1441 = vmatprep.subr.bf16.mxu1 %v2290_v34 }
  0xda   : > { %1128 = vmatpush2.bf16.msra.mxu0 %v2252_v2 }
  0xdb   : > { %1129 = vmatprep.subr.bf16.mxu0 %v2257_v3  ;;  %v493_v3 = vrot.slane %v484_v63, %v2728_v62 }
  0xdc   : > { %1442 = vmatpush2.bf16.msra.mxu1 %v2288_v35 }
  0xdd   : > { %1443 = vmatprep.subr.bf16.mxu1 %v2293_v36 }
  0xde   : > { %1130 = vmatpush2.bf16.msra.mxu0 %v2255_v4  ;;  %v489_v4 = vrot.slane %v484_v63, %v2733_v0 }
  0xe0   : > { %1444 = vmatpush2.bf16.msra.mxu1 %v2291_v37 }
  0xe1   : > { %1132 = vmatmul.mubr.bf16.vlgmr.msra.gmra.mxu0 %v376_v9  ;;  %1445 = vmatprep.subr.bf16.mxu1 %v2296_v38 }
  0xe2   : > { %1141 = vmatprep.mubr.bf16.mxu0 %v384_v10 }
  0xe4   : > { %1446 = vmatpush2.bf16.msra.mxu1 %v2294_v39 }
  0xe5   : > { %1447 = vmatprep.subr.bf16.mxu1 %v2299_v40 }
  0xe8   : > { %1448 = vmatpush2.bf16.msra.mxu1 %v2297_v41 }
  0xe9   : > { %1142 = vmatmul.mubr.bf16.gmra.mxu0 %v383_v13  ;;  %1449 = vmatprep.subr.bf16.mxu1 %v2302_v42 }
  0xec   : > { %1450 = vmatpush2.bf16.msra.mxu1 %v2300_v43 }
  0xed   : > { %1451 = vmatprep.subr.bf16.mxu1 %v2305_v44 }
  0xf0   : > { %1452 = vmatpush2.bf16.msra.mxu1 %v2303_v45 }
 0x161   : > { %v1027_v50 = vpop.f32.mrf.mxu0 }
 0x162   : > { %v1028_v8 = vadd.f32 %v1027_v50, %v489_v4 }
 0x163   : > { %v1080_v46 = vpop.f32.mrf.mxu1  ;;  %v1029_v52 = vpop.f32.mrf.mxu0 }
 0x164   : > { %v1030_v7 = vadd.f32 %v1029_v52, %v493_v3  ;;  %v1081_v15 = vadd.f32 %v1080_v46, %v1028_v8 }
 0x165   : > { %v1082_v47 = vpop.f32.mrf.mxu1  ;;  %v1031_v54 = vpop.f32.mrf.mxu0 }
 0x166   : > { %v1032_v10 = vadd.f32 %v1031_v54, %v489_v4  ;;  %v1083_v13 = vadd.f32 %v1082_v47, %v1030_v7  ;;  %v1482_v7 = vld [vmem:[%s2818_s5] sm:$0x3] }
 0x167   : > { %v1084_v48 = vpop.f32.mrf.mxu1  ;;  %v1033_v57 = vpop.f32.mrf.mxu0 }
 0x168   : > { %v1034_v14 = vadd.f32 %v1033_v57, %v493_v3  ;;  %v1085_v17 = vadd.f32 %v1084_v48, %v1032_v10 }
 0x169   : > { %v1086_v49 = vpop.f32.mrf.mxu1  ;;  %v1037_v60 = vpop.f32.mrf.mxu0 }
 0x16a   : > { %v1087_v22 = vadd.f32 %v1086_v49, %v1034_v14  ;;  %v1038_v25 = vadd.f32 %v1037_v60, %v489_v4 }
 0x16b   : > { %v1090_v51 = vpop.f32.mrf.mxu1  ;;  %v1039_v1 = vpop.f32.mrf.mxu0 }
 0x16c   : > { %v1040_v23 = vadd.f32 %v1039_v1, %v493_v3  ;;  %v1091_v37 = vadd.f32 %v1090_v51, %v1038_v25 }
 0x16d   : > { %v1092_v53 = vpop.f32.mrf.mxu1  ;;  %v1041_v5 = vpop.f32.mrf.mxu0 }
 0x16e   : > { %v1042_v27 = vadd.f32 %v1041_v5, %v489_v4  ;;  %v1093_v34 = vadd.f32 %v1092_v53, %v1040_v23 }
 0x16f   : > { %v1094_v55 = vpop.f32.mrf.mxu1  ;;  %v1043_v9 = vpop.f32.mrf.mxu0 }
 0x170   : > { %v1044_v35 = vadd.f32 %v1043_v9, %v493_v3  ;;  %v1095_v40 = vadd.f32 %v1094_v55, %v1042_v27 }
 0x171   : > { %v1096_v58 = vpop.f32.mrf.mxu1 }
 0x172   : > { %v1097_v48 = vadd.f32 %v1096_v58, %v1044_v35  ;;  %v1249_v58 = vld [vmem:[%s2817_s4] sm:$0x3] }
 0x173   : > { %v1186_v61 = vpop.f32.mrf.mxu1  ;;  %v1254_v4 = vrot.slane %v1249_v58, %v2733_v0  ;;  %v1258_v5 = vrot.slane %v1249_v58, %v2728_v62 }
 0x175   : > { %v1188_v2 = vpop.f32.mrf.mxu1 }
 0x177   : > { %v1190_v6 = vpop.f32.mrf.mxu1 }
 0x179   : > { %v1192_v12 = vpop.f32.mrf.mxu1 }
 0x17b   : > { %v1196_v21 = vpop.f32.mrf.mxu1 }
 0x17d   : > { %v1198_v32 = vpop.f32.mrf.mxu1 }
 0x17f   : > { %v1200_v46 = vpop.f32.mrf.mxu1 }
 0x181   : > { %v1202_v59 = vpop.f32.mrf.mxu1 }
 0x1a1   : > { %v1133_v11 = vpop.f32.mrf.mxu0 }
 0x1a2   : > { %v1134_v19 = vadd.f32 %v1133_v11, %v1081_v15 }
 0x1a3   : > { %v1135_v16 = vpop.f32.mrf.mxu0 }
 0x1a4   : > { %v1136_v18 = vadd.f32 %v1135_v16, %v1083_v13  ;;  %v1187_v31 = vadd.f32 %v1186_v61, %v1134_v19  ;;  %v1491_v13 = vrot.slane %v1482_v7, %v2728_v62 }
 0x1a5   : > { %v1137_v20 = vpop.f32.mrf.mxu0 }
 0x1a6   : > { %v1138_v24 = vadd.f32 %v1137_v20, %v1085_v17  ;;  %v1189_v28 = vadd.f32 %v1188_v2, %v1136_v18  ;;  %v1205_v44 = vmax.f32 %v1187_v31, 0.0 }
 0x1a7   : > { %v1139_v26 = vpop.f32.mrf.mxu0 }
 0x1a8   : > { %v1191_v29 = vadd.f32 %v1190_v6, %v1138_v24  ;;  %v1140_v30 = vadd.f32 %v1139_v26, %v1087_v22  ;;  %v1206_v41 = vmax.f32 %v1189_v28, 0.0 }
 0x1a9   : > { %v1143_v33 = vpop.f32.mrf.mxu0 }
 0x1aa   : > { %v1193_v36 = vadd.f32 %v1192_v12, %v1140_v30  ;;  %v1207_v38 = vmax.f32 %v1191_v29, 0.0  ;;  %v1144_v45 = vadd.f32 %v1143_v33, %v1091_v37  ;;  %v1487_v12 = vrot.slane %v1482_v7, %v2733_v0 }
 0x1ab   : > { %v1145_v39 = vpop.f32.mrf.mxu0 }
 0x1ac   : > { %v1208_v42 = vmax.f32 %v1193_v36, 0.0  ;;  %v1146_v43 = vadd.f32 %v1145_v39, %v1093_v34  ;;  %v1213_v52 = vpack.c.bf16 %v1207_v38, %v1205_v44  ;;  %v1197_v51 = vadd.f32 %v1196_v21, %v1144_v45 }
 0x1ad   : > { %v1147_v47 = vpop.f32.mrf.mxu0 }
 0x1ae   : > { %v1148_v49 = vadd.f32 %v1147_v47, %v1095_v40  ;;  %v1214_v50 = vpack.c.bf16 %v1208_v42, %v1206_v41  ;;  %v1199_v56 = vadd.f32 %v1198_v32, %v1146_v43  ;;  %v1209_v1 = vmax.f32 %v1197_v51, 0.0  ;;  %v1960_v43 = vld [vmem:[#allocation2] ss:$0 sm:$0xff] }
 0x1af   : > { %v1149_v54 = vpop.f32.mrf.mxu0 }
 0x1b0   : > { %v1201_v53 = vadd.f32 %v1200_v46, %v1148_v49  ;;  %v1150_v57 = vadd.f32 %v1149_v54, %v1097_v48  ;;  %1453 = vmatprep.mubr.bf16.mxu1 %v1214_v50  ;;  %v1210_v61 = vmax.f32 %v1199_v56, 0.0 }
 0x1b1   : > { %1454 = vmatmul.mubr.bf16.vlgmr.msra.gmra.mxu1 %v1213_v52 }
 0x1b2   : > { %v1203_v55 = vadd.f32 %v1202_v59, %v1150_v57  ;;  %v1211_v60 = vmax.f32 %v1201_v53, 0.0 }
 0x1b4   : > { %v1212_v63 = vmax.f32 %v1203_v55, 0.0  ;;  %v1215_v3 = vpack.c.bf16 %v1211_v60, %v1209_v1 }
 0x1b6   : > { %v1216_v2 = vpack.c.bf16 %v1212_v63, %v1210_v61 }
 0x1b8   : > { %1463 = vmatprep.mubr.bf16.mxu1 %v1216_v2 }
 0x1b9   : > { %1464 = vmatmul.mubr.bf16.gmra.mxu1 %v1215_v3 }
 0x271   : > { %v1455_v6 = vpop.f32.mrf.mxu1 }
 0x272   : > { %v1456_v8 = vadd.f32 %v1455_v6, %v1254_v4 }
 0x273   : > { %v1457_v9 = vpop.f32.mrf.mxu1 }
 0x274   : > { %v1474_v10 = vmax.f32 %v1456_v8, 0.0  ;;  %v1458_v11 = vadd.f32 %v1457_v9, %v1258_v5 }
 0x275   : > { %v1459_v14 = vpop.f32.mrf.mxu1 }
 0x276   : > { %v1475_v15 = vmax.f32 %v1458_v11, 0.0  ;;  %v1460_v16 = vadd.f32 %v1459_v14, %v1254_v4  ;;  %v1494_v20 = vmul.f32 %v1487_v12, %v1474_v10 }
 0x277   : > { %v1461_v17 = vpop.f32.mrf.mxu1 }
 0x278   : > { %v1476_v18 = vmax.f32 %v1460_v16, 0.0  ;;  %v1462_v19 = vadd.f32 %v1461_v17, %v1258_v5  ;;  %v1495_v21 = vmul.f32 %v1491_v13, %v1475_v15 }
 0x279   : > { %v1465_v22 = vpop.f32.mrf.mxu1 }
 0x27a   : > { %v1477_v23 = vmax.f32 %v1462_v19, 0.0  ;;  %v1466_v24 = vadd.f32 %v1465_v22, %v1254_v4  ;;  %v1502_v25 = vadd.f32 %v1495_v21, %v1494_v20  ;;  %v1496_v27 = vmul.f32 %v1487_v12, %v1476_v18 }
 0x27b   : > { %v1467_v26 = vpop.f32.mrf.mxu1 }
 0x27c   : > { %v1497_v28 = vmul.f32 %v1491_v13, %v1477_v23  ;;  %v1478_v29 = vmax.f32 %v1466_v24, 0.0  ;;  %v1468_v30 = vadd.f32 %v1467_v26, %v1258_v5  ;;  %1503 = vadd.xlane.f32.xlu0 %v1502_v25 }
 0x27d   : > { %v1469_v0 = vpop.f32.mrf.mxu1 }
 0x27e   : > { %v1479_v62 = vmax.f32 %v1468_v30, 0.0  ;;  %v1470_v31 = vadd.f32 %v1469_v0, %v1254_v4  ;;  %v1505_v32 = vadd.f32 %v1497_v28, %v1496_v27  ;;  %v1498_v36 = vmul.f32 %v1487_v12, %v1478_v29 }
 0x27f   : > { %v1471_v33 = vpop.f32.mrf.mxu1 }
 0x280   : > { %v1480_v34 = vmax.f32 %v1470_v31, 0.0  ;;  %v1472_v35 = vadd.f32 %v1471_v33, %v1258_v5  ;;  %1506 = vadd.xlane.f32.xlu0 %v1505_v32  ;;  %v1499_v37 = vmul.f32 %v1491_v13, %v1479_v62 }
 0x282   : > { %v1481_v38 = vmax.f32 %v1472_v35, 0.0  ;;  %v1508_v39 = vadd.f32 %v1499_v37, %v1498_v36  ;;  %v1500_v40 = vmul.f32 %v1487_v12, %v1480_v34 }
 0x284   : > { %v1501_v41 = vmul.f32 %v1491_v13, %v1481_v38  ;;  %1509 = vadd.xlane.f32.xlu1 %v1508_v39 }
 0x286   : > { %v1511_v42 = vadd.f32 %v1501_v41, %v1500_v40 }
 0x288   : > { %1512 = vadd.xlane.f32.xlu1 %v1511_v42 }
 0x305   : > { %v1504_v44 = vpop.xlane.xlu0 %1503 }
 0x306   : > { %v1521_v45 = vadd.f32 %v1960_v43, %v1504_v44 }
 0x308   : > { %v1961_v46 = vmul.f32 -1.442695, %v1521_v45 }
 0x309   : > { %v1507_v47 = vpop.xlane.xlu0 %1506 }
 0x30a   : > { %2306 = vpow2.f32 %v1961_v46  ;;  %v1522_v48 = vadd.f32 %v1960_v43, %v1507_v47 }
 0x30c   : > { %v1962_v49 = vmul.f32 -1.442695, %v1522_v48 }
 0x30d   : > { %v1510_v50 = vpop.xlane.xlu1 %1509 }
 0x30e   : > { %2308 = vpow2.f32 %v1962_v49  ;;  %v1523_v52 = vadd.f32 %v1960_v43, %v1510_v50 }
 0x310   : > { %v1963_v54 = vmul.f32 -1.442695, %v1523_v52 }
 0x311   : > { %v1513_v56 = vpop.xlane.xlu1 %1512 }
 0x312   : > { %2310 = vpow2.f32 %v1963_v54  ;;  %v1524_v53 = vadd.f32 %v1960_v43, %v1513_v56 }
 0x314   : > { %v1964_v57 = vmul.f32 -1.442695, %v1524_v53 }
 0x316   : > { %2312 = vpow2.f32 %v1964_v57 }
 0x317   : > { %v2307_v51 = vpop.eup %2306 }
 0x318   : > { %v1537_v59 = vadd.f32 1.0, %v2307_v51 }
 0x31a   : > { %2314 = vrcp.f32 %v1537_v59 }
 0x31b   : > { %v2309_v55 = vpop.eup %2308 }
 0x31c   : > { %v1538_v60 = vadd.f32 1.0, %v2309_v55 }
 0x31e   : > { %2316 = vrcp.f32 %v1538_v60 }
 0x31f   : > { %v2311_v61 = vpop.eup %2310 }
 0x320   : > { %v1539_v63 = vadd.f32 1.0, %v2311_v61 }
 0x322   : > { %2318 = vrcp.f32 %v1539_v63 }
 0x323   : > { %v2313_v1 = vpop.eup %2312 }
 0x324   : > { %v1540_v2 = vadd.f32 1.0, %v2313_v1 }
 0x326   : > { %2320 = vrcp.f32 %v1540_v2 }
 0x327   : > { %v2315_v3 = vpop.eup %2314 }
 0x328   : > { %1550 = vst.msk [vmem:[%s2748_s16] sm:$0xff] %vm1549_vm1, %v2315_v3 }
 0x32b   : > { %v2317_v58 = vpop.eup %2316 }
 0x32c   : > { %1551 = vst.msk [vmem:[%s2748_s16 + $0x8] sm:$0xff] %vm1549_vm1, %v2317_v58 }
 0x32f   : > { %v2319_v4 = vpop.eup %2318 }
 0x330   : > { %1552 = vst.msk [vmem:[%s2748_s16 + $0x10] sm:$0xff] %vm1549_vm1, %v2319_v4  ;;  %1560 = sbr.rel (!%p2831_p0) target bundleno = 860 (0x35c), region = 64 }
 0x333   : > { %v2321_v5 = vpop.eup %2320 }
 0x334   : > { %1553 = vst.msk [vmem:[%s2748_s16 + $0x18] sm:$0xff] %vm1549_vm1, %v2321_v5 }
 0x335   : > { %s2842_s19 = smov (!%p1563_p9, %s1562_s19), 4 }
 0x336   : > { %s1967_s26 = sshll.u32 %s2842_s19, 7 }
 0x337   : > { %p1970_p12 = scmp.eq.s32.totalorder %s1967_s26, 0 }
 0x338   : > { %s2767_s13 = sshrl.u32 (!%p1970_p12), %s2842_s19, 2 }
 0x339   : > { %1571 = sbr.rel (%p1970_p12) target bundleno = 860 (0x35c), region = 68  ;;  %p1971_p1 = scmp.le.s32.totalorder (!%p1970_p12), %s2767_s13, 0 }
 0x33e   : > { %1747 = sbr.rel (%p1971_p1) target bundleno = 843 (0x34b), region = 150  ;;  %s2832_s6 = smov (!%p1971_p1), %s2761_s24 }
 0x33f   : > { %s2833_s8 = smov (!%p1971_p1), %s2748_s16  ;;  %s2776_s9 = smov (!%p1971_p1), 0  }
 0x340   : > { %s2484_s29 = smov (!%p1971_p1), 0  }
 0x343 LB: >> { %v1640_v6 = vld [vmem:[%s2478_s8] sm:$0xff]  ;;  %v1642_v7 = vld [vmem:[%s2478_s8 + $0x8] sm:$0xff]  ;;  %v1644_v8 = vld [vmem:[%s2478_s8 + $0x10] sm:$0xff]  ;;  %s1648_s12 = sadd.s32 1, %s2482_s9  ;;  %s1634_s29 = sadd.s32 1, %s2486_s29   ;;  %s2486_s29 = sphi %s2484_s29, %s1634_s29   ;;  %s2482_s9 = sphi %s2776_s9, %s2834_s9   ;;  %s2478_s8 = sphi %s2833_s8, %s1653_s8   ;;  %s2474_s6 = sphi %s2832_s6, %s1654_s6  }
 0x344   : >> { %1641 = vst [vmem:[%s2474_s6] sm:$0xff] %v1640_v6  ;;  %1643 = vst [vmem:[%s2474_s6 + $0x8] sm:$0xff] %v1642_v7  ;;  %v1646_v9 = vld [vmem:[%s2478_s8 + $0x18] sm:$0xff]  ;;  %p1649_p2 = scmp.ge.s32.totalorder %s1648_s12, %s2767_s13  ;;  %p1633_p6 = scmp.ge.s32.totalorder %s1634_s29, %s2767_s13 }
 0x345   : >> { %1645 = vst [vmem:[%s2474_s6 + $0x10] sm:$0xff] %v1644_v8  ;;  %1647 = vst [vmem:[%s2474_s6 + $0x18] sm:$0xff] %v1646_v9 }
 0x346   : >> { %s2844_s12 = smov (%p1649_p2, %s1648_s12), 0  ;;  %1636 = sbr.rel (!%p1633_p6) target bundleno = 835 (0x343), region = 156 }
 0x347   : >> { %s1972_s14 = sshll.u32 %s2844_s12, 5  ;;  %s2834_s9 = smov %s2844_s12 }
 0x348   : >> { %s1653_s8 = scalar_lea.vmem %s2748_s16, %s1972_s14 [#allocation8]   ;;  %s1654_s6 = scalar_lea.vmem %s2761_s24, %s1972_s14  }
 0x34b PF: > { %s2792_s20 = sand.u32 3, %s2842_s19   ;;  %s1983_s23 = sshll.u32 %s2767_s13, 5 }
 0x34c   : > { %s1659_s21 = scalar_lea.vmem %s2748_s16, %s1983_s23 [#allocation8]   ;;  %s1661_s25 = scalar_lea.vmem %s2761_s24, %s1983_s23  }
 0x34d   : > { %p1977_p3 = scmp.le.s32.totalorder %s2792_s20, 0 }
 0x34e   : > { %s2488_s15 = smov (!%p1977_p3), %s1661_s25   ;;  %s2492_s18 = smov (!%p1977_p3), %s1659_s21  }
 0x34f   : > { %1761 = sbr.rel (%p1977_p3) target bundleno = 860 (0x35c), region = 161  ;;  %s2496_s17 = smov (!%p1977_p3), 0  }
 0x350   : > { %s2500_s11 = smov (!%p1977_p3), 0  }
 0x354 LB: >> { %v1671_v10 = vld [vmem:[%s2494_s18] sm:$0xff]  ;;  %s1673_s19 = sadd.s32 1, %s2498_s17  ;;  %s1665_s11 = sadd.s32 1, %s2502_s11   ;;  %s2502_s11 = sphi %s2500_s11, %s1665_s11   ;;  %s2498_s17 = sphi %s2496_s17, %s2497_s17   ;;  %s2494_s18 = sphi %s2492_s18, %s1678_s18   ;;  %s2490_s15 = sphi %s2488_s15, %s1679_s15  }
 0x355   : >> { %1672 = vst [vmem:[%s2490_s15] sm:$0xff] %v1671_v10  ;;  %p1674_p7 = scmp.ge.s32.totalorder %s1673_s19, %s2792_s20  ;;  %p1664_p5 = scmp.ge.s32.totalorder %s1665_s11, %s2792_s20 }
 0x357   : >> { %s2846_s19 = smov (%p1674_p7, %s1673_s19), 0  ;;  %1667 = sbr.rel (!%p1664_p5) target bundleno = 852 (0x354), region = 167 }
 0x358   : >> { %s1978_s16 = sshll.u32 %s2846_s19, 3  ;;  %s2497_s17 = smov %s2846_s19  }
 0x359   : >> { %s1678_s18 = scalar_lea.vmem %s1659_s21, %s1978_s16 [#allocation8]   ;;  %s1679_s15 = scalar_lea.vmem %s1661_s25, %s1978_s16  }
 0x35c PF: > { %p20_p8 = scmp.ge.s32.totalorder %s2577_s30, 4   ;;  %s2835_s26 = smov %s2462_s27 }
 0x35d   : > { %s2836_s27 = smov %s2466_s28  ;;  %s2837_s28 = smov %s2587_s10 }
 0x35e   : > { %s2838_s29 = smov %s2577_s30  ;;  %22 = sbr.rel (!%p20_p8) target bundleno = 7 (0x7), region = 178 }
 0x363   :  { %1695 = vsyncpa [#allocation4], 1 }
 0x364   :  { %1697 = vsyncpa [#allocation4 + $0x1], 1 }
 0x365   :  { %1698 = vsyncpa [#allocation6], 1 }

</bundles_post_ra>
